<compile_context>
chip_gen: v7x
topology: tpu7x:2x2x1
jax: 0.10.0
libtpu: 0.0.40
codegen_flags: <defaults>
</compile_context>

<pallas_src>
import functools
import math

import jax
import jax.numpy as jnp
from jax.experimental import pallas as pl
from jax.experimental.pallas import tpu as pltpu


def _round_up(a, b):
    return (a + b - 1) // b * b


def _crqi_kernel(x_ref, o_ref, *, true_len):
    x = x_ref[...].astype(jnp.float32)                       # (tm, Lp)
    lp = x.shape[-1]

    # Adjacent-pair sums via an XLU lane roll (no MXU, no (L,L) band matrix):
    #   rolled[:, j] = x[:, (j+1) % Lp]   (shift = Lp-1 ≡ -1, jnp.roll convention)
    # Zeroing the wrapped last lane reproduces the SAME-pad "one zero on the
    # right", so pair[:, j] = x[:, j] + x[:, j+1] (with x[:, Lp] := 0)
    #            = 2 * MyAvgPool1dPadSame(k=2, s=1)(x).
    rolled = pltpu.roll(x, shift=lp - 1, axis=1)
    lane = jax.lax.broadcasted_iota(jnp.int32, x.shape, 1)
    pair = x + jnp.where(lane == lp - 1, 0.0, rolled)

    if true_len == lp:
        pair_max = pair
        pair_sum = pair
    else:
        # Lane-padded case (L not a multiple of 128): ignore padded lanes.
        valid = lane < true_len
        pair_max = jnp.where(valid, pair, -jnp.inf)
        pair_sum = jnp.where(valid, pair, 0.0)

    m = jnp.max(pair_max, axis=-1, keepdims=True)            # (tm, 1)
    s = jnp.sum(pair_sum, axis=-1, keepdims=True)            # (tm, 1)
    # CRQI = max(avg) / sum(avg); the avg-pool's 1/2 scale cancels in the ratio.
    # NOTE: sum(avg) ~ 0 (possible for signed inputs) gives Inf/NaN, exactly as
    # the PyTorch module does; no guard is added on purpose.
    o_ref[...] = (m / s).astype(o_ref.dtype)


def crqi_module(x, *, vmem_budget_bytes=12 << 20):
    """CRQI_module.forward.  x: (..., L) float array -> (..., 1)."""
    *lead, L = x.shape
    R = math.prod(lead)
    out_dtype = x.dtype if jnp.issubdtype(x.dtype, jnp.floating) else jnp.float32
    x2 = x.reshape(R, L)

    # Keep the lane dim a multiple of 128 so the in-kernel roll stays on the
    # native vreg layout; padded lanes are masked inside the kernel.
    # TODO(synk): for huge non-128-multiple L this pad is an extra HBM copy; a
    # ragged lane mask on the unpadded array would avoid it.
    Lp = _round_up(max(L, 128), 128)
    if Lp != L:
        x2 = jnp.pad(x2, ((0, 0), (0, Lp - L)))

    # Honest VMEM accounting: double-buffered native-dtype input tile plus ~3
    # f32-wide temporaries (upcast / rolled / pair).  The 12 MiB default stays
    # inside every generation's scoped-VMEM default (16/32/32 MiB); the explicit
    # vmem_limit_bytes adds headroom and stays under v7x's 64 MiB physical VMEM.
    itemsize = x2.dtype.itemsize
    bytes_per_row = (2 * itemsize + 3 * 4) * Lp
    max_rows = max(8, (vmem_budget_bytes // bytes_per_row) // 8 * 8)
    if R <= 8:
        tm = R
    elif R <= max_rows:
        # Keep >= 2 grid steps so v7x's two TensorCores both get rows.
        tm = _round_up(pl.cdiv(R, 2), 8)
    else:
        tm = max_rows
    grid = (pl.cdiv(R, tm),)
    # When R % tm != 0 the trailing padded rows compute garbage ratios, but their
    # stores are masked so valid outputs are unaffected (do not "fix" with masks).

    vmem_limit = int(min(48 << 20, max(16 << 20, 2 * tm * bytes_per_row)))

    out = pl.pallas_call(
        functools.partial(_crqi_kernel, true_len=L),
        out_shape=jax.ShapeDtypeStruct((R, 1), out_dtype),
        grid_spec=pltpu.PrefetchScalarGridSpec(
            num_scalar_prefetch=0,
            grid=grid,
            in_specs=[pl.BlockSpec((tm, Lp), lambda i: (i, 0))],
            out_specs=pl.BlockSpec((tm, 1), lambda i: (i, 0)),
        ),
        compiler_params=pltpu.CompilerParams(
            dimension_semantics=("parallel",),
            vmem_limit_bytes=vmem_limit,
        ),
        cost_estimate=pl.CostEstimate(
            flops=3 * R * Lp,
            transcendentals=0,
            bytes_accessed=itemsize * R * Lp + jnp.dtype(out_dtype).itemsize * R,
        ),
    )(x2)
    return out.reshape(*lead, 1)


if __name__ == "__main__":
    B, C, L = 2, 4, 16
    key = jax.random.PRNGKey(0)
    # Non-negative inputs (as for the feature maps this module consumes) keep
    # the denominator away from zero.
    x = jax.random.uniform(key, (B, C, L), dtype=jnp.float32, minval=0.1, maxval=1.0)

    out = jax.block_until_ready(crqi_module(x))

    # Pure-JAX reference with the literal PyTorch semantics:
    # F.pad(..., (0, 1)) -> AvgPool1d(k=2, s=1) -> AdaptiveMaxPool1d(1) / sum.
    xp = jnp.pad(x, ((0, 0), (0, 0), (0, 1)))
    y = 0.5 * (xp[..., :-1] + xp[..., 1:])
    ref = jnp.max(y, axis=-1, keepdims=True) / jnp.sum(y, axis=-1, keepdims=True)

    assert out.shape == (B, C, 1), out.shape
    assert jnp.allclose(out, ref, atol=1e-5, rtol=1e-5), "mismatch vs reference"
    print("KERNEL_OK")
</pallas_src>

<mosaic_0001>
module attributes {stable_mosaic.version = 11 : i64} {
  func.func @_crqi_kernel(%arg0: i32, %arg1: memref<8x128xf32, #tpu.memory_space<vmem>>, %arg2: memref<8x1xf32, #tpu.memory_space<vmem>>) attributes {dimension_semantics = [#tpu.dimension_semantics<parallel>], iteration_bounds = array<i64: 1>, scalar_prefetch = 0 : i64, scratch_operands = 0 : i64, tpu.core_type = #tpu.core_type<tc>, window_params = [{transform_indices = @transform_0, window_bounds = array<i64: 8, 128>}, {transform_indices = @transform_1, window_bounds = array<i64: 8, 1>}]} {
    %c0 = arith.constant 0 : index
    %c0_0 = arith.constant 0 : index
    %0 = vector.load %arg1[%c0, %c0_0] : memref<8x128xf32, #tpu.memory_space<vmem>>, vector<8x128xf32>
    %c127_i32 = arith.constant 127 : i32
    %1 = tpu.dynamic_rotate %0 by %c127_i32 dim 1 : vector<8x128xf32>, i32 -> vector<8x128xf32>
    %2 = tpu.iota {dimensions = array<i32: 1>} : vector<8x128xi32>
    %c127_i32_1 = arith.constant 127 : i32
    %3 = vector.broadcast %c127_i32_1 : i32 to vector<8x128xi32>
    %4 = arith.cmpi eq, %2, %3 : vector<8x128xi32>
    %cst = arith.constant 0.000000e+00 : f32
    %5 = vector.broadcast %cst : f32 to vector<8x128xf32>
    %6 = arith.select %4, %5, %1 : vector<8x128xi1>, vector<8x128xf32>
    %7 = arith.addf %0, %6 : vector<8x128xf32>
    %c16_i32 = arith.constant 16 : i32
    %8 = vector.broadcast %c16_i32 : i32 to vector<8x128xi32>
    %9 = arith.cmpi slt, %2, %8 : vector<8x128xi32>
    %cst_2 = arith.constant 0xFF800000 : f32
    %10 = vector.broadcast %cst_2 : f32 to vector<8x128xf32>
    %11 = arith.select %9, %7, %10 : vector<8x128xi1>, vector<8x128xf32>
    %cst_3 = arith.constant 0.000000e+00 : f32
    %12 = vector.broadcast %cst_3 : f32 to vector<8x128xf32>
    %13 = arith.select %9, %7, %12 : vector<8x128xi1>, vector<8x128xf32>
    %cst_4 = arith.constant dense<0xFF800000> : vector<8xf32>
    %14 = vector.multi_reduction <maximumf>, %11, %cst_4 [1] : vector<8x128xf32> to vector<8xf32>
    %15 = vector.shape_cast %14 : vector<8xf32> to vector<8x1xf32>
    %cst_5 = arith.constant dense<0.000000e+00> : vector<8xf32>
    %16 = vector.multi_reduction <add>, %13, %cst_5 [1] : vector<8x128xf32> to vector<8xf32>
    %17 = vector.shape_cast %16 : vector<8xf32> to vector<8x1xf32>
    %18 = arith.divf %15, %17 : vector<8x1xf32>
    %c0_6 = arith.constant 0 : index
    %c0_7 = arith.constant 0 : index
    %19 = vector.load %arg2[%c0_6, %c0_7] : memref<8x1xf32, #tpu.memory_space<vmem>>, vector<8x1xf32>
    tpu.vector_store %arg2[%c0_6, %c0_7], %18 {strides = array<i32>} : memref<8x1xf32, #tpu.memory_space<vmem>>, vector<8x1xf32>,
    return
  }
  func.func @transform_0(%arg0: i32) -> (i32, i32) {
    %c0_i32 = arith.constant 0 : i32
    %c0_i32_0 = arith.constant 0 : i32
    return %arg0, %c0_i32 : i32, i32
  }
  func.func @transform_1(%arg0: i32) -> (i32, i32) {
    %c0_i32 = arith.constant 0 : i32
    %c0_i32_0 = arith.constant 0 : i32
    return %arg0, %c0_i32 : i32, i32
  }
}

</mosaic_0001>

<bundles_post_ra>
// kernel: tpu_custom_call.1
= control target key start
LH: loop header
LB: loop body
LE: loop exit
PB: predicated region body
PF: predicated region fallthrough
CT: control target
= control target key end

     0   :  { %6 = vsyncpa [#allocation3], 0  ;;  %s72_s6 = smov [#allocation2]   ;;  %s99_s0 = inlined_call_operand.hbm [shape: f32[8,128], index: 0, kind: input, shape index: {}]   ;;  %s100_s1 = inlined_call_operand.vmem [shape: f32[8,1], index: 1, kind: output, shape index: {}]  }
   0x1   :  { %s13_s7 = sshll.u32 %s72_s6, 4  ;;  %s48_s10 = scalar_lea.hbm %s99_s0, 128  ;;  %s14_s7 = int_to_ptr.vmem [resolvable:$true] %s13_s7 }
   0x2   :  { %p49_p0 = scmp.ne.s32.totalorder %s99_s0, %s48_s10  ;;  %p52_p1 = scmp.lt.u32.totalorder %s48_s10, %s99_s0 }
   0x4   :  { %p54_p2 = pnand %p52_p1, %p49_p0 }
   0x6   :  { %57 = shalt.err (!%p54_p2)
}
   0x7   :  { %s58_s15 = scalar_lea.vmem %s14_s7, 128  ;;  %p63_p4 = scmp.lt.s32.totalorder %s14_s7, %s14_s7 }
   0x8   :  { %p59_p3 = scmp.ne.s32.totalorder %s14_s7, %s58_s15  ;;  %p64_p5 = scmp.lt.s32.totalorder %s58_s15, %s58_s15 }
   0xa   :  { %p65_p6 = por %p64_p5, %p63_p4 }
   0xc   :  { %p66_p7 = pnand %p65_p6, %p59_p3 }
   0xe   :  { %69 = shalt.err (!%p66_p7)
}
   0xf   :  { %16 = dma.hbm_to_vmem [thread:$0]  %s99_s0, 128, %s14_s7, [#allocation3]  }
  0x10   :  { %70 = dma.done.wait [#allocation3], 128  }
  0x11   :  { %71 = vsyncadd [#allocation3], 4294967168  ;;  %v20_v0 = vld [vmem:[#allocation2] sm:$0xff]  ;;  %s73_s18 = smov 127   ;;  %v23_v1 = vlaneseq  ;;  %vm37_vm2 = vcmask 7168  }
  0x12   :  { %21 = vrot.lane.b32.xlu0 %v20_v0, %s73_s18 }
  0x13   :  { %v24_v2 = vand.u32 127, %v23_v1 }
  0x15   :  { %vm25_vm0 = vcmp.eq.s32.totalorder %v24_v2, 127  ;;  %vm28_vm1 = vcmp.lt.s32.totalorder %v24_v2, 16 }
  0x84   :  { %v22_v3 = vpop.permute.xlu0 %21 }
  0x85   :  { %v26_v4 = vsel %vm25_vm0, 0.0, %v22_v3 }
  0x86   :  { %v27_v5 = vadd.f32 %v26_v4, %v20_v0 }
  0x88   :  { %v30_v6 = vsel %vm28_vm1, %v27_v5, 0.0  ;;  %v29_v7 = vsel %vm28_vm1, %v27_v5, -inf }
  0x89   :  { %33 = vadd.xlane.f32.xlu0 %v30_v6  ;;  %31 = vmax.xlane.f32.xlu1 %v29_v7 }
 0x116   :  { %v34_v8 = vpop.xlane.xlu0 %33  ;;  %v32_v10 = vpop.xlane.xlu1 %31 }
 0x117   :  { %46 = vrcp.f32 %v34_v8 }
 0x121   :  { %v47_v9 = vpop.eup %46 }
 0x122   :  { %v36_v11 = vmul.f32 %v47_v9, %v32_v10 }
 0x124   :  { %38 = vst.msk [vmem:[%s100_s1] sm:$0xff] %vm37_vm2, %v36_v11 }
 0x125   :  { %43 = vsyncpa [#allocation3], 1 }

</bundles_post_ra>
